<compile_context>
chip_gen: v7x
topology: tpu7x:2x2x1
jax: 0.10.0
libtpu: 0.0.40
codegen_flags: <defaults>
</compile_context>

<pallas_src>
import jax
import jax.numpy as jnp
from jax.experimental import pallas as pl
from jax.experimental.pallas import tpu as pltpu

IN_F, HID1, HID2, OUT_F = 18, 64, 32, 1


def mlp_kernel(x_ref, w1_ref, b1_ref, w2_ref, b2_ref, w3r_ref, b3_ref, o_ref):
    # bf16 operands on the MXU (single pass), f32 accumulation + f32 elementwise.
    x = x_ref[...].astype(jnp.bfloat16)
    h1 = jnp.dot(x, w1_ref[...], preferred_element_type=jnp.float32) + b1_ref[...]
    h1 = jnp.maximum(h1, 0.0)
    h2 = jnp.dot(h1.astype(jnp.bfloat16), w2_ref[...],
                 preferred_element_type=jnp.float32) + b2_ref[...]
    h2 = jnp.maximum(h2, 0.0)
    # Final layer has N=1: elementwise mul + lane reduction on VPU/XLU (f32),
    # avoiding an MXU pass that would use 1 of 128+ result columns.
    o = jnp.sum(h2 * w3r_ref[...], axis=-1, keepdims=True) + b3_ref[...]
    o_ref[...] = o.astype(o_ref.dtype)
    # TODO(synk): batch-on-lanes layout ([18, B] in, [1, B] out) would give dense
    # MXU result tiles + unmasked lane-dense stores; only worth it if profiling
    # post-bf16 still shows MXU/store slack being wasted.


def my_model_forward(x, params, tb=4096):
    """x: [B, 18] float32 -> [B, 1] float32 (binary-classification logit)."""
    w1, b1, w2, b2, w3, b3 = params
    B = x.shape[0]

    # Batch tile: multiple of 8 (sublane constraint).  Cap at ~ceil(B/2) so that
    # mid-size batches yield >= 2 balanced grid steps (v7x megacore); no padding of
    # x — Pallas clips the ragged last block and never writes the garbage rows.
    tb = max(8, (int(tb) // 8) * 8)
    half = (((B + 1) // 2) + 7) // 8 * 8
    tb = min(tb, max(half, 8))
    grid = pl.cdiv(B, tb)

    # bf16 weights for the two MXU layers; biases / last-layer row stay f32.
    w1_bf = w1.astype(jnp.bfloat16)
    w2_bf = w2.astype(jnp.bfloat16)
    w3_row = w3.reshape(1, HID2)

    # Weights/biases: full-array blocks with constant index_map -> DMA'd once,
    # resident in VMEM across all grid steps.
    def resident(a):
        return pl.BlockSpec(a.shape, lambda i: (0,) * a.ndim)

    out = pl.pallas_call(
        mlp_kernel,
        out_shape=jax.ShapeDtypeStruct((B, OUT_F), jnp.float32),
        grid=(grid,),
        in_specs=[
            pl.BlockSpec((tb, IN_F), lambda i: (i, 0)),      # streamed per step
            resident(w1_bf), resident(b1),
            resident(w2_bf), resident(b2),
            resident(w3_row), resident(b3),
        ],
        out_specs=pl.BlockSpec((tb, OUT_F), lambda i: (i, 0)),
        compiler_params=pltpu.CompilerParams(
            dimension_semantics=("parallel",),          # megacore split on v7x
            vmem_limit_bytes=32 * 1024 * 1024,          # lift v5e's 16 MiB default
        ),
    )(x, w1_bf, b1, w2_bf, b2, w3_row, b3)

    return out


def init_params(key):
    """Deterministic init matching PyTorch Linear shapes, stored as [in, out]."""
    dims = [(IN_F, HID1), (HID1, HID2), (HID2, OUT_F)]
    params = []
    for i, (fan_in, fan_out) in enumerate(dims):
        kw, kb, key = jax.random.split(jax.random.fold_in(key, i), 3)
        bound = 1.0 / jnp.sqrt(fan_in)  # PyTorch default uniform(-1/sqrt(fan_in), ...)
        w = jax.random.uniform(kw, (fan_in, fan_out), jnp.float32, -bound, bound)
        b = jax.random.uniform(kb, (1, fan_out), jnp.float32, -bound, bound)
        params += [w, b]
    return tuple(params)


def reference_forward_f32(x, params):
    w1, b1, w2, b2, w3, b3 = params
    h1 = jnp.maximum(x @ w1 + b1, 0.0)
    h2 = jnp.maximum(h1 @ w2 + b2, 0.0)
    return h2 @ w3 + b3


def reference_forward_bf16(x, params):
    """Same bf16-operand / f32-accumulate recipe as the kernel (tight check)."""
    w1, b1, w2, b2, w3, b3 = params
    h1 = jnp.dot(x.astype(jnp.bfloat16), w1.astype(jnp.bfloat16),
                 preferred_element_type=jnp.float32) + b1
    h1 = jnp.maximum(h1, 0.0)
    h2 = jnp.dot(h1.astype(jnp.bfloat16), w2.astype(jnp.bfloat16),
                 preferred_element_type=jnp.float32) + b2
    h2 = jnp.maximum(h2, 0.0)
    return jnp.sum(h2 * w3.reshape(1, HID2), axis=-1, keepdims=True) + b3


if __name__ == "__main__":
    key = jax.random.PRNGKey(0)
    kx, kp = jax.random.split(key)

    # Small test shape consistent with the module (Linear(18, ...)).
    B = 8
    x = jax.random.normal(kx, (B, IN_F), jnp.float32)
    params = init_params(kp)

    out = jax.block_until_ready(my_model_forward(x, params))
    assert out.shape == (B, OUT_F), out.shape
    ref_bf = reference_forward_bf16(x, params)
    ref_f32 = reference_forward_f32(x, params)
    assert jnp.allclose(out, ref_bf, atol=1e-4, rtol=1e-3), "mismatch vs bf16 reference"
    assert jnp.allclose(out, ref_f32, atol=3e-2, rtol=3e-2), "mismatch vs f32 reference"

    # Also exercise the tiled / ragged-last-block path (B not a multiple of tb).
    B2 = 2051
    x2 = jax.random.normal(jax.random.fold_in(kx, 7), (B2, IN_F), jnp.float32)
    out2 = jax.block_until_ready(my_model_forward(x2, params, tb=512))
    assert out2.shape == (B2, OUT_F), out2.shape
    ref2_bf = reference_forward_bf16(x2, params)
    ref2_f32 = reference_forward_f32(x2, params)
    assert jnp.allclose(out2, ref2_bf, atol=1e-4, rtol=1e-3), "mismatch vs bf16 reference (tiled)"
    assert jnp.allclose(out2, ref2_f32, atol=3e-2, rtol=3e-2), "mismatch vs f32 reference (tiled)"

    print("KERNEL_OK")
</pallas_src>

<mosaic_0001>
module attributes {stable_mosaic.version = 11 : i64} {
  func.func @mlp_kernel(%arg0: i32, %arg1: memref<8x18xf32, #tpu.memory_space<vmem>>, %arg2: memref<18x64xbf16, #tpu.memory_space<vmem>>, %arg3: memref<1x64xf32, #tpu.memory_space<vmem>>, %arg4: memref<64x32xbf16, #tpu.memory_space<vmem>>, %arg5: memref<1x32xf32, #tpu.memory_space<vmem>>, %arg6: memref<1x32xf32, #tpu.memory_space<vmem>>, %arg7: memref<1x1xf32, #tpu.memory_space<vmem>>, %arg8: memref<8x1xf32, #tpu.memory_space<vmem>>) attributes {dimension_semantics = [#tpu.dimension_semantics<parallel>], iteration_bounds = array<i64: 1>, scalar_prefetch = 0 : i64, scratch_operands = 0 : i64, tpu.core_type = #tpu.core_type<tc>, window_params = [{transform_indices = @transform_0, window_bounds = array<i64: 8, 18>}, {pipeline_mode = #tpu.pipeline_mode<synchronous>, transform_indices = @transform_1, window_bounds = array<i64: 18, 64>}, {pipeline_mode = #tpu.pipeline_mode<synchronous>, transform_indices = @transform_2, window_bounds = array<i64: 1, 64>}, {pipeline_mode = #tpu.pipeline_mode<synchronous>, transform_indices = @transform_3, window_bounds = array<i64: 64, 32>}, {pipeline_mode = #tpu.pipeline_mode<synchronous>, transform_indices = @transform_4, window_bounds = array<i64: 1, 32>}, {pipeline_mode = #tpu.pipeline_mode<synchronous>, transform_indices = @transform_5, window_bounds = array<i64: 1, 32>}, {pipeline_mode = #tpu.pipeline_mode<synchronous>, transform_indices = @transform_6, window_bounds = array<i64: 1, 1>}, {transform_indices = @transform_7, window_bounds = array<i64: 8, 1>}]} {
    %c0 = arith.constant 0 : index
    %c0_0 = arith.constant 0 : index
    %0 = vector.load %arg1[%c0, %c0_0] : memref<8x18xf32, #tpu.memory_space<vmem>>, vector<8x18xf32>
    %1 = arith.truncf %0 : vector<8x18xf32> to vector<8x18xbf16>
    %c0_1 = arith.constant 0 : index
    %c0_2 = arith.constant 0 : index
    %2 = vector.load %arg2[%c0_1, %c0_2] : memref<18x64xbf16, #tpu.memory_space<vmem>>, vector<18x64xbf16>
    %cst = arith.constant dense<0.000000e+00> : vector<8x64xf32>
    %3 = tpu.matmul %1, %2, %cst {dimension_numbers = #tpu.dot_dimension_numbers<[1], [0], [0], [1], [0, 0, 1, 1], [], []>} : vector<8x18xbf16>, vector<18x64xbf16>, vector<8x64xf32> -> vector<8x64xf32>
    %c0_3 = arith.constant 0 : index
    %c0_4 = arith.constant 0 : index
    %4 = vector.load %arg3[%c0_3, %c0_4] : memref<1x64xf32, #tpu.memory_space<vmem>>, vector<1x64xf32>
    %5 = vector.broadcast %4 : vector<1x64xf32> to vector<8x64xf32>
    %6 = arith.addf %3, %5 : vector<8x64xf32>
    %cst_5 = arith.constant 0.000000e+00 : f32
    %7 = vector.broadcast %cst_5 : f32 to vector<8x64xf32>
    %8 = arith.maximumf %6, %7 : vector<8x64xf32>
    %9 = arith.truncf %8 : vector<8x64xf32> to vector<8x64xbf16>
    %c0_6 = arith.constant 0 : index
    %c0_7 = arith.constant 0 : index
    %10 = vector.load %arg4[%c0_6, %c0_7] : memref<64x32xbf16, #tpu.memory_space<vmem>>, vector<64x32xbf16>
    %cst_8 = arith.constant dense<0.000000e+00> : vector<8x32xf32>
    %11 = tpu.matmul %9, %10, %cst_8 {dimension_numbers = #tpu.dot_dimension_numbers<[1], [0], [0], [1], [0, 0, 1, 1], [], []>} : vector<8x64xbf16>, vector<64x32xbf16>, vector<8x32xf32> -> vector<8x32xf32>
    %c0_9 = arith.constant 0 : index
    %c0_10 = arith.constant 0 : index
    %12 = vector.load %arg5[%c0_9, %c0_10] : memref<1x32xf32, #tpu.memory_space<vmem>>, vector<1x32xf32>
    %13 = vector.broadcast %12 : vector<1x32xf32> to vector<8x32xf32>
    %14 = arith.addf %11, %13 : vector<8x32xf32>
    %cst_11 = arith.constant 0.000000e+00 : f32
    %15 = vector.broadcast %cst_11 : f32 to vector<8x32xf32>
    %16 = arith.maximumf %14, %15 : vector<8x32xf32>
    %c0_12 = arith.constant 0 : index
    %c0_13 = arith.constant 0 : index
    %17 = vector.load %arg6[%c0_12, %c0_13] : memref<1x32xf32, #tpu.memory_space<vmem>>, vector<1x32xf32>
    %18 = vector.broadcast %17 : vector<1x32xf32> to vector<8x32xf32>
    %19 = arith.mulf %16, %18 : vector<8x32xf32>
    %cst_14 = arith.constant dense<0.000000e+00> : vector<8xf32>
    %20 = vector.multi_reduction <add>, %19, %cst_14 [1] : vector<8x32xf32> to vector<8xf32>
    %21 = vector.shape_cast %20 : vector<8xf32> to vector<8x1xf32>
    %c0_15 = arith.constant 0 : index
    %c0_16 = arith.constant 0 : index
    %22 = vector.load %arg7[%c0_15, %c0_16] : memref<1x1xf32, #tpu.memory_space<vmem>>, vector<1x1xf32>
    %23 = vector.broadcast %22 : vector<1x1xf32> to vector<8x1xf32>
    %24 = arith.addf %21, %23 : vector<8x1xf32>
    %c0_17 = arith.constant 0 : index
    %c0_18 = arith.constant 0 : index
    %25 = vector.load %arg8[%c0_17, %c0_18] : memref<8x1xf32, #tpu.memory_space<vmem>>, vector<8x1xf32>
    tpu.vector_store %arg8[%c0_17, %c0_18], %24 {strides = array<i32>} : memref<8x1xf32, #tpu.memory_space<vmem>>, vector<8x1xf32>,
    return
  }
  func.func @transform_0(%arg0: i32) -> (i32, i32) {
    %c0_i32 = arith.constant 0 : i32
    %c0_i32_0 = arith.constant 0 : i32
    return %arg0, %c0_i32 : i32, i32
  }
  func.func @transform_1(%arg0: i32) -> (i32, i32) {
    %c0_i32 = arith.constant 0 : i32
    %c0_i32_0 = arith.constant 0 : i32
    %c0_i32_1 = arith.constant 0 : i32
    return %c0_i32, %c0_i32_0 : i32, i32
  }
  func.func @transform_2(%arg0: i32) -> (i32, i32) {
    %c0_i32 = arith.constant 0 : i32
    %c0_i32_0 = arith.constant 0 : i32
    %c0_i32_1 = arith.constant 0 : i32
    return %c0_i32, %c0_i32_0 : i32, i32
  }
  func.func @transform_3(%arg0: i32) -> (i32, i32) {
    %c0_i32 = arith.constant 0 : i32
    %c0_i32_0 = arith.constant 0 : i32
    %c0_i32_1 = arith.constant 0 : i32
    return %c0_i32, %c0_i32_0 : i32, i32
  }
  func.func @transform_4(%arg0: i32) -> (i32, i32) {
    %c0_i32 = arith.constant 0 : i32
    %c0_i32_0 = arith.constant 0 : i32
    %c0_i32_1 = arith.constant 0 : i32
    return %c0_i32, %c0_i32_0 : i32, i32
  }
  func.func @transform_5(%arg0: i32) -> (i32, i32) {
    %c0_i32 = arith.constant 0 : i32
    %c0_i32_0 = arith.constant 0 : i32
    %c0_i32_1 = arith.constant 0 : i32
    return %c0_i32, %c0_i32_0 : i32, i32
  }
  func.func @transform_6(%arg0: i32) -> (i32, i32) {
    %c0_i32 = arith.constant 0 : i32
    %c0_i32_0 = arith.constant 0 : i32
    %c0_i32_1 = arith.constant 0 : i32
    return %c0_i32, %c0_i32_0 : i32, i32
  }
  func.func @transform_7(%arg0: i32) -> (i32, i32) {
    %c0_i32 = arith.constant 0 : i32
    %c0_i32_0 = arith.constant 0 : i32
    return %arg0, %c0_i32 : i32, i32
  }
}

</mosaic_0001>

<bundles_post_ra>
// kernel: tpu_custom_call.1
= control target key start
LH: loop header
LB: loop body
LE: loop exit
PB: predicated region body
PF: predicated region fallthrough
CT: control target
= control target key end

     0   :  { %v258_v0 = vmov 0.0   ;;  %vm54_vm0 = vcmask 1040384   ;;  %vm259_vm1 = vmmov 0   ;;  %vm50_vm2 = vcmask 146432   ;;  %s336_s1 = inlined_call_operand.vmem [shape: bf16[18,64], index: 1, kind: input, shape index: {}]   ;;  %s337_s0 = inlined_call_operand.vmem [shape: f32[8,18], index: 0, kind: input, shape index: {}]   ;;  %s338_s3 = inlined_call_operand.vmem [shape: bf16[64,32], index: 3, kind: input, shape index: {}]   ;;  %s339_s2 = inlined_call_operand.vmem [shape: f32[1,64], index: 2, kind: input, shape index: {}]   ;;  %s340_s6 = inlined_call_operand.<no memory space> [shape: f32[1,1], index: 6, kind: input, shape index: {}]   ;;  %s341_s4 = inlined_call_operand.vmem [shape: f32[1,32], index: 4, kind: input, shape index: {}]   ;;  %s342_s5 = inlined_call_operand.vmem [shape: f32[1,32], index: 5, kind: input, shape index: {}]   ;;  %s343_s7 = inlined_call_operand.vmem [shape: f32[8,1], index: 7, kind: output, shape index: {}]  }
   0x1   :  { %230 = vmatprep.subr.bf16.mxu0 %v258_v0  ;;  %v252_v1 = vld [vmem:[%s336_s1] sm:$0xff]   ;;  %234 = vmatprep.mubr.msk.bf16.mxu0 %vm259_vm1, %v258_v0  ;;  %v253_v2 = vld [vmem:[%s336_s1 + $0x8] ss:$0 sps:$4 sm:$0x11]   ;;  %v256_v8 = vld [vmem:[%s338_s3 + $0x10] sm:$0xff]   ;;  %vm139_vm3 = vcmask 523264   ;;  %v12_v18 = vstv %s340_s6 }
   0x2   :  { %v29_v3 = vld [vmem:[%s337_s0] sm:$0xff]  ;;  %238 = vmatprep.subr.bf16.mxu1 %v258_v0  ;;  %246 = vmatprep.mubr.msk.bf16.mxu1 %vm259_vm1, %v258_v0  ;;  %v56_v5 = vsel %vm54_vm0, %v253_v2, 0  ;;  %v255_v6 = vld [vmem:[%s338_s3 + $0x8] sm:$0xff]   ;;  %v257_v9 = vld [vmem:[%s338_s3 + $0x18] sm:$0xff]   ;;  %13 = vst [vmem:[#allocation2] sm:$0x1] %v12_v18 }
   0x3   :  { %231 = vmatpush3.bf16.msra.mxu0 %v252_v1  ;;  %v254_v4 = vld [vmem:[%s338_s3] sm:$0xff]   ;;  %v30_v7 = vpack.c.bf16 %v29_v3, %v29_v3  ;;  %vm192_vm4 = vcmask 261120   ;;  %vm204_vm5 = vcmask 7168  }
   0x4   :  { %232 = vmatprep.subr.bf16.mxu0 %v258_v0  ;;  %239 = vmatpush3.bf16.msra.mxu1 %v254_v4  ;;  %v210_v10 = vld [vmem:[%s339_s2] ss:$0 sm:$0xff] }
   0x5   :  { %240 = vmatprep.subr.bf16.mxu1 %v258_v0  ;;  %v214_v19 = vld [vmem:[%s341_s4] ss:$0 sm:$0xff] }
   0x6   :  { %v220_v24 = vld [vmem:[%s342_s5] ss:$0 sm:$0xff] }
   0x7   :  { %233 = vmatpush3.bf16.msra.mxu0 %v56_v5 }
   0x8   :  { %241 = vmatpush3.bf16.msra.mxu1 %v255_v6 }
   0x9   :  { %242 = vmatprep.subr.bf16.mxu1 %v258_v0  ;;  %v221_v29 = vld [vmem:[#allocation2] ss:$0 sm:$0xff] }
   0xa   :  { %235 = vmatmul.mubr.msk.bf16.vlgmr.msra.gmra.mrb[0].mxu0 %vm50_vm2, %v30_v7 }
   0xc   :  { %243 = vmatpush3.bf16.msra.mxu1 %v256_v8 }
   0xd   :  { %244 = vmatprep.subr.bf16.mxu1 %v258_v0 }
  0x10   :  { %245 = vmatpush3.bf16.msra.mxu1 %v257_v9 }
  0xdd   :  { %v92_v11 = vpop.f32.mrb[0].mxu0 }
  0xde   :  { %v93_v12 = vadd.f32 %v210_v10, %v92_v11  ;;  %v236_v13 = vpop.f32.mrb[1].mxu0 }
  0xdf   :  { %v95_v14 = vpop.f32.mrb[2].mxu0 }
  0xe0   :  { %v98_v15 = vmax.f32 %v93_v12, 0.0  ;;  %v237_v16 = vpop.f32.mrb[3].mxu0 }
  0xe2   :  { %v99_v17 = vpack.c.bf16 %v98_v15, %v98_v15 }
  0xe4   :  { %247 = vmatmul.mubr.msk.bf16.vlgmr.msra.gmra.mrb[0].mxu1 %vm139_vm3, %v99_v17 }
 0x1b7   :  { %v177_v20 = vpop.f32.mrb[0].mxu1 }
 0x1b8   :  { %v178_v21 = vadd.f32 %v214_v19, %v177_v20  ;;  %v248_v22 = vpop.f32.mrb[1].mxu1 }
 0x1b9   :  { %v180_v23 = vpop.f32.mrb[2].mxu1 }
 0x1ba   :  { %v183_v25 = vmax.f32 %v178_v21, 0.0  ;;  %v249_v26 = vpop.f32.mrb[3].mxu1 }
 0x1bc   :  { %v191_v27 = vmul.f32 %v220_v24, %v183_v25 }
 0x1be   :  { %v193_v28 = vsel %vm192_vm4, %v191_v27, 0.0 }
 0x1bf   :  { %194 = vadd.xlane.f32.xlu0 %v193_v28 }
 0x24c   :  { %v195_v30 = vpop.xlane.xlu0 %194 }
 0x24d   :  { %v203_v31 = vadd.f32 %v221_v29, %v195_v30 }
 0x24f   :  { %205 = vst.msk [vmem:[%s343_s7] sm:$0xff] %vm204_vm5, %v203_v31 }

</bundles_post_ra>
